<compile_context>
chip_gen: v6e
topology: v6e:2x2x1
jax: 0.10.0
libtpu: 0.0.40
codegen_flags: <defaults>
</compile_context>

<pallas_src>
import functools

import jax
import jax.numpy as jnp
from jax.experimental import pallas as pl
from jax.experimental.pallas import tpu as pltpu

CIN = 3
C1, C2, C3, NCLS = 64, 128, 256, 40
MAX_ROWS = 4096            # target rows (= batch items x points) per grid step


def _pointnet_block_kernel(x_ref, w1_ref, b1_ref, w2_ref, b2_ref,
                           w3_ref, b3_ref, o_ref, *, tb, tn):
    """One grid step: per-point MLP on tb*tn rows, then per-batch-item max."""
    x = x_ref[...]                                   # (tb*tn, 3)  f32
    w1 = w1_ref[...]                                 # (3, 64)     f32

    # Layer 1 (3 -> 64) on the VPU: three broadcast mul-adds (no MXU, no pad).
    h = (x[:, 0:1] * w1[0:1, :]
         + x[:, 1:2] * w1[1:2, :]
         + x[:, 2:3] * w1[2:3, :]) + b1_ref[...]
    h = jnp.maximum(h, 0.0)                          # (rows, 64)  f32

    # Layers 2 & 3 on the MXU: bf16 operands, f32 accumulation.
    h = jnp.dot(h.astype(jnp.bfloat16), w2_ref[...],
                preferred_element_type=jnp.float32)
    h = jnp.maximum(h + b2_ref[...], 0.0)            # (rows, 128) f32

    h = jnp.dot(h.astype(jnp.bfloat16), w3_ref[...],
                preferred_element_type=jnp.float32)
    h = jnp.maximum(h + b3_ref[...], 0.0)            # (rows, 256) f32

    # Per-batch-item max over this step's tn points (static unroll over tb;
    # segments land on sublane-tile boundaries when tn % 8 == 0).
    for i in range(tb):
        seg = h[i * tn:(i + 1) * tn, :]              # (tn, 256)
        o_ref[i, 0, :, :] = jnp.max(seg, axis=0, keepdims=True)


def _choose_tiles(B, N):
    """Pick (tb, tn): rows-per-step = tb*tn, with B % tb == 0 and N % tn == 0."""
    if N <= MAX_ROWS:
        tn = N
        tb = max(1, min(B, MAX_ROWS // max(N, 1)))
        if B >= 2:                        # keep >= 2 grid points (v7x megacore)
            tb = min(tb, max(1, B // 2))
        while B % tb:
            tb -= 1
        if B == 1 and N % 16 == 0 and N >= 16:
            tn = N // 2                   # single sample: split points over 2 TCs
    else:
        tb = 1
        tn = 0
        for cand in range(MAX_ROWS, 7, -8):   # largest mult-of-8 divisor of N
            if N % cand == 0:
                tn = cand
                break
        if tn == 0:
            # TODO(synk): mask ragged point counts instead of one giant block.
            tb, tn = B, N
    if (tb * tn) % 8 != 0 and tb * tn != B * N:
        # TODO(synk): ragged-N masking; fall back to a single full-size block.
        tb, tn = B, N
    return tb, tn


@jax.jit
def cls3d_forward(x, w1, b1, w2, b2, w3, b3, wf, bf):
    """x: (B, N, 3) float32 point cloud -> (B, 40) logits."""
    B, N, C = x.shape
    assert C == CIN

    tb, tn = _choose_tiles(B, N)
    rows = tb * tn
    n_bt = B // tb                        # batch-group grid axis
    n_pt = N // tn                        # point-tile grid axis

    # Raw f32 input flattened to rows (layout-preserving, no HBM repack pass).
    x_flat = x.reshape(B * N, CIN)
    w2_b = w2.astype(jnp.bfloat16)
    w3_b = w3.astype(jnp.bfloat16)

    const = lambda gb, gt: (0, 0)

    flops = 2 * B * N * (CIN * C1 + C1 * C2 + C2 * C3)
    bytes_accessed = (B * N * CIN * 4
                      + w1.size * 4 + b1.size * 4 + w2.size * 2 + b2.size * 4
                      + w3.size * 2 + b3.size * 4
                      + B * n_pt * C3 * 4)
    cost = pl.CostEstimate(flops=flops, transcendentals=0,
                           bytes_accessed=bytes_accessed)

    partial_max = pl.pallas_call(
        functools.partial(_pointnet_block_kernel, tb=tb, tn=tn),
        out_shape=jax.ShapeDtypeStruct((B, n_pt, 1, C3), jnp.float32),
        grid_spec=pltpu.PrefetchScalarGridSpec(
            num_scalar_prefetch=0,
            grid=(n_bt, n_pt),
            in_specs=[
                # row-block index: gb*n_pt + gt (tb > 1 only when n_pt == 1)
                pl.BlockSpec((rows, CIN), lambda gb, gt: (gb * n_pt + gt, 0)),
                pl.BlockSpec((CIN, C1), const),
                pl.BlockSpec((1, C1), const),
                pl.BlockSpec((C1, C2), const),
                pl.BlockSpec((1, C2), const),
                pl.BlockSpec((C2, C3), const),
                pl.BlockSpec((1, C3), const),
            ],
            out_specs=pl.BlockSpec((tb, 1, 1, C3),
                                   lambda gb, gt: (gb, gt, 0, 0)),
        ),
        compiler_params=pltpu.CompilerParams(
            dimension_semantics=("parallel", "parallel"),
            vmem_limit_bytes=40 * 1024 * 1024),
        cost_estimate=cost,
    )(x_flat, w1, b1, w2_b, b2, w3_b, b3)

    # Finish in XLA: max over point tiles, then the tiny 256->40 FC (keeps the
    # 40-wide, masked-store-prone output out of the kernel).
    features = jnp.max(partial_max, axis=(1, 2))                # (B, 256)
    return jnp.dot(features, wf, preferred_element_type=jnp.float32) + bf


def reference_forward(x, w1, b1, w2, b2, w3, b3, wf, bf):
    """Pure-JAX f32 reference matching the PyTorch forward (x: (B, N, 3))."""
    h = jax.nn.relu(jnp.einsum("bnc,cd->bnd", x, w1) + b1)
    h = jax.nn.relu(jnp.einsum("bnc,cd->bnd", h, w2) + b2)
    h = jax.nn.relu(jnp.einsum("bnc,cd->bnd", h, w3) + b3)
    h = jnp.max(h, axis=1)
    return jnp.einsum("bc,cd->bd", h, wf) + bf


def reference_forward_matched(x, w1, b1, w2, b2, w3, b3, wf, bf):
    """Precision-matched reference: f32 layer 1 (VPU), bf16/f32-acc layers 2&3."""
    bfl = jnp.bfloat16
    h = (x[..., 0:1] * w1[0:1, :] + x[..., 1:2] * w1[1:2, :]
         + x[..., 2:3] * w1[2:3, :]) + b1
    h = jax.nn.relu(h)
    h = jnp.einsum("bnc,cd->bnd", h.astype(bfl), w2.astype(bfl),
                   preferred_element_type=jnp.float32)
    h = jax.nn.relu(h + b2)
    h = jnp.einsum("bnc,cd->bnd", h.astype(bfl), w3.astype(bfl),
                   preferred_element_type=jnp.float32)
    h = jax.nn.relu(h + b3)
    h = jnp.max(h, axis=1)
    return jnp.dot(h, wf, preferred_element_type=jnp.float32) + bf


def init_params(key):
    """Deterministic parameter init (shapes match the torch module)."""
    ks = jax.random.split(key, 8)

    def u(k, shape, fan_in):
        bound = 1.0 / jnp.sqrt(fan_in)
        return jax.random.uniform(k, shape, jnp.float32, -bound, bound)

    # Conv1d(cin, cout, 1) weight (cout, cin, 1) stored transposed as (cin, cout)
    w1 = u(ks[0], (CIN, C1), CIN); b1 = u(ks[1], (1, C1), CIN)
    w2 = u(ks[2], (C1, C2), C1);   b2 = u(ks[3], (1, C2), C1)
    w3 = u(ks[4], (C2, C3), C2);   b3 = u(ks[5], (1, C3), C2)
    # Linear(256, 40) weight (40, 256) stored transposed as (256, 40)
    wf = u(ks[6], (C3, NCLS), C3); bf = u(ks[7], (1, NCLS), C3)
    return w1, b1, w2, b2, w3, b3, wf, bf


if __name__ == "__main__":
    key = jax.random.PRNGKey(0)
    kx, kp = jax.random.split(key)
    params = init_params(kp)

    # (2, 64): 2 parallel grid points; (8, 128): tb=4 batched rows per step;
    # (1, 64): single sample split into 2 point tiles (megacore path).
    for (B, N) in [(2, 64), (8, 128), (1, 64)]:
        kx, sub = jax.random.split(kx)
        x = jax.random.normal(sub, (B, N, CIN), jnp.float32)

        out = jax.block_until_ready(cls3d_forward(x, *params))
        assert out.shape == (B, NCLS)

        # Tight check vs a reference with the same per-layer precision.
        ref_m = reference_forward_matched(x, *params)
        assert jnp.allclose(out, ref_m, atol=1e-3, rtol=1e-3), \
            f"mismatch vs precision-matched reference (B={B}, N={N})"

        # Loose sanity check vs the full-f32 reference (bf16 rounding only).
        ref_f = reference_forward(x, *params)
        assert jnp.allclose(out, ref_f, atol=1e-1, rtol=1e-1), \
            f"mismatch vs f32 reference (B={B}, N={N})"

    print("KERNEL_OK")
</pallas_src>

<mosaic_0001>
module attributes {stable_mosaic.version = 11 : i64} {
  func.func @_pointnet_block_kernel(%arg0: i32, %arg1: i32, %arg2: memref<64x3xf32, #tpu.memory_space<vmem>>, %arg3: memref<3x64xf32, #tpu.memory_space<vmem>>, %arg4: memref<1x64xf32, #tpu.memory_space<vmem>>, %arg5: memref<64x128xbf16, #tpu.memory_space<vmem>>, %arg6: memref<1x128xf32, #tpu.memory_space<vmem>>, %arg7: memref<128x256xbf16, #tpu.memory_space<vmem>>, %arg8: memref<1x256xf32, #tpu.memory_space<vmem>>, %arg9: memref<1x1x1x256xf32, #tpu.memory_space<vmem>>) attributes {dimension_semantics = [#tpu.dimension_semantics<parallel>, #tpu.dimension_semantics<parallel>], iteration_bounds = array<i64: 2, 1>, scalar_prefetch = 0 : i64, scratch_operands = 0 : i64, tpu.core_type = #tpu.core_type<tc>, window_params = [{transform_indices = @transform_0, window_bounds = array<i64: 64, 3>}, {pipeline_mode = #tpu.pipeline_mode<synchronous>, transform_indices = @transform_1, window_bounds = array<i64: 3, 64>}, {pipeline_mode = #tpu.pipeline_mode<synchronous>, transform_indices = @transform_2, window_bounds = array<i64: 1, 64>}, {pipeline_mode = #tpu.pipeline_mode<synchronous>, transform_indices = @transform_3, window_bounds = array<i64: 64, 128>}, {pipeline_mode = #tpu.pipeline_mode<synchronous>, transform_indices = @transform_4, window_bounds = array<i64: 1, 128>}, {pipeline_mode = #tpu.pipeline_mode<synchronous>, transform_indices = @transform_5, window_bounds = array<i64: 128, 256>}, {pipeline_mode = #tpu.pipeline_mode<synchronous>, transform_indices = @transform_6, window_bounds = array<i64: 1, 256>}, {transform_indices = @transform_7, window_bounds = array<i64: 1, 1, 1, 256>}]} {
    %c0 = arith.constant 0 : index
    %c0_0 = arith.constant 0 : index
    %0 = vector.load %arg2[%c0, %c0_0] : memref<64x3xf32, #tpu.memory_space<vmem>>, vector<64x3xf32>
    %c0_1 = arith.constant 0 : index
    %c0_2 = arith.constant 0 : index
    %1 = vector.load %arg3[%c0_1, %c0_2] : memref<3x64xf32, #tpu.memory_space<vmem>>, vector<3x64xf32>
    %2 = vector.extract_strided_slice %0 {offsets = [0, 0], sizes = [64, 1], strides = [1, 1]} : vector<64x3xf32> to vector<64x1xf32>
    %3 = vector.extract_strided_slice %1 {offsets = [0, 0], sizes = [1, 64], strides = [1, 1]} : vector<3x64xf32> to vector<1x64xf32>
    %4 = vector.broadcast %2 : vector<64x1xf32> to vector<64x64xf32>
    %5 = vector.broadcast %3 : vector<1x64xf32> to vector<64x64xf32>
    %6 = arith.mulf %4, %5 : vector<64x64xf32>
    %7 = vector.extract_strided_slice %0 {offsets = [0, 1], sizes = [64, 1], strides = [1, 1]} : vector<64x3xf32> to vector<64x1xf32>
    %8 = vector.extract_strided_slice %1 {offsets = [1, 0], sizes = [1, 64], strides = [1, 1]} : vector<3x64xf32> to vector<1x64xf32>
    %9 = vector.broadcast %7 : vector<64x1xf32> to vector<64x64xf32>
    %10 = vector.broadcast %8 : vector<1x64xf32> to vector<64x64xf32>
    %11 = arith.mulf %9, %10 : vector<64x64xf32>
    %12 = arith.addf %6, %11 : vector<64x64xf32>
    %13 = vector.extract_strided_slice %0 {offsets = [0, 2], sizes = [64, 1], strides = [1, 1]} : vector<64x3xf32> to vector<64x1xf32>
    %14 = vector.extract_strided_slice %1 {offsets = [2, 0], sizes = [1, 64], strides = [1, 1]} : vector<3x64xf32> to vector<1x64xf32>
    %15 = vector.broadcast %13 : vector<64x1xf32> to vector<64x64xf32>
    %16 = vector.broadcast %14 : vector<1x64xf32> to vector<64x64xf32>
    %17 = arith.mulf %15, %16 : vector<64x64xf32>
    %18 = arith.addf %12, %17 : vector<64x64xf32>
    %c0_3 = arith.constant 0 : index
    %c0_4 = arith.constant 0 : index
    %19 = vector.load %arg4[%c0_3, %c0_4] : memref<1x64xf32, #tpu.memory_space<vmem>>, vector<1x64xf32>
    %20 = vector.broadcast %19 : vector<1x64xf32> to vector<64x64xf32>
    %21 = arith.addf %18, %20 : vector<64x64xf32>
    %cst = arith.constant 0.000000e+00 : f32
    %22 = vector.broadcast %cst : f32 to vector<64x64xf32>
    %23 = arith.maximumf %21, %22 : vector<64x64xf32>
    %24 = arith.truncf %23 : vector<64x64xf32> to vector<64x64xbf16>
    %c0_5 = arith.constant 0 : index
    %c0_6 = arith.constant 0 : index
    %25 = vector.load %arg5[%c0_5, %c0_6] : memref<64x128xbf16, #tpu.memory_space<vmem>>, vector<64x128xbf16>
    %cst_7 = arith.constant dense<0.000000e+00> : vector<64x128xf32>
    %26 = tpu.matmul %24, %25, %cst_7 {dimension_numbers = #tpu.dot_dimension_numbers<[1], [0], [0], [1], [0, 0, 1, 1], [], []>} : vector<64x64xbf16>, vector<64x128xbf16>, vector<64x128xf32> -> vector<64x128xf32>
    %c0_8 = arith.constant 0 : index
    %c0_9 = arith.constant 0 : index
    %27 = vector.load %arg6[%c0_8, %c0_9] : memref<1x128xf32, #tpu.memory_space<vmem>>, vector<1x128xf32>
    %28 = vector.broadcast %27 : vector<1x128xf32> to vector<64x128xf32>
    %29 = arith.addf %26, %28 : vector<64x128xf32>
    %cst_10 = arith.constant 0.000000e+00 : f32
    %30 = vector.broadcast %cst_10 : f32 to vector<64x128xf32>
    %31 = arith.maximumf %29, %30 : vector<64x128xf32>
    %32 = arith.truncf %31 : vector<64x128xf32> to vector<64x128xbf16>
    %c0_11 = arith.constant 0 : index
    %c0_12 = arith.constant 0 : index
    %33 = vector.load %arg7[%c0_11, %c0_12] : memref<128x256xbf16, #tpu.memory_space<vmem>>, vector<128x256xbf16>
    %cst_13 = arith.constant dense<0.000000e+00> : vector<64x256xf32>
    %34 = tpu.matmul %32, %33, %cst_13 {dimension_numbers = #tpu.dot_dimension_numbers<[1], [0], [0], [1], [0, 0, 1, 1], [], []>} : vector<64x128xbf16>, vector<128x256xbf16>, vector<64x256xf32> -> vector<64x256xf32>
    %c0_14 = arith.constant 0 : index
    %c0_15 = arith.constant 0 : index
    %35 = vector.load %arg8[%c0_14, %c0_15] : memref<1x256xf32, #tpu.memory_space<vmem>>, vector<1x256xf32>
    %36 = vector.broadcast %35 : vector<1x256xf32> to vector<64x256xf32>
    %37 = arith.addf %34, %36 : vector<64x256xf32>
    %cst_16 = arith.constant 0.000000e+00 : f32
    %38 = vector.broadcast %cst_16 : f32 to vector<64x256xf32>
    %39 = arith.maximumf %37, %38 : vector<64x256xf32>
    %cst_17 = arith.constant dense<0xFF800000> : vector<256xf32>
    %40 = vector.multi_reduction <maximumf>, %39, %cst_17 [0] : vector<64x256xf32> to vector<256xf32>
    %41 = vector.shape_cast %40 : vector<256xf32> to vector<1x256xf32>
    %c0_18 = arith.constant 0 : index
    %c0_19 = arith.constant 0 : index
    %c0_20 = arith.constant 0 : index
    %c0_21 = arith.constant 0 : index
    %42 = vector.load %arg9[%c0_18, %c0_19, %c0_20, %c0_21] : memref<1x1x1x256xf32, #tpu.memory_space<vmem>>, vector<1x1x1x256xf32>
    %43 = vector.shape_cast %42 : vector<1x1x1x256xf32> to vector<1x256xf32>
    %44 = vector.shape_cast %41 : vector<1x256xf32> to vector<1x1x1x256xf32>
    tpu.vector_store %arg9[%c0_18, %c0_19, %c0_20, %c0_21], %44 {strides = array<i32>} : memref<1x1x1x256xf32, #tpu.memory_space<vmem>>, vector<1x1x1x256xf32>,
    return
  }
  func.func @transform_0(%arg0: i32, %arg1: i32) -> (i32, i32) {
    %c1_i32 = arith.constant 1 : i32
    %0 = arith.muli %arg0, %c1_i32 : i32
    %1 = arith.addi %0, %arg1 : i32
    %c0_i32 = arith.constant 0 : i32
    %c0_i32_0 = arith.constant 0 : i32
    return %1, %c0_i32 : i32, i32
  }
  func.func @transform_1(%arg0: i32, %arg1: i32) -> (i32, i32) {
    %c0_i32 = arith.constant 0 : i32
    %c0_i32_0 = arith.constant 0 : i32
    %c0_i32_1 = arith.constant 0 : i32
    return %c0_i32, %c0_i32_0 : i32, i32
  }
  func.func @transform_2(%arg0: i32, %arg1: i32) -> (i32, i32) {
    %c0_i32 = arith.constant 0 : i32
    %c0_i32_0 = arith.constant 0 : i32
    %c0_i32_1 = arith.constant 0 : i32
    return %c0_i32, %c0_i32_0 : i32, i32
  }
  func.func @transform_3(%arg0: i32, %arg1: i32) -> (i32, i32) {
    %c0_i32 = arith.constant 0 : i32
    %c0_i32_0 = arith.constant 0 : i32
    %c0_i32_1 = arith.constant 0 : i32
    return %c0_i32, %c0_i32_0 : i32, i32
  }
  func.func @transform_4(%arg0: i32, %arg1: i32) -> (i32, i32) {
    %c0_i32 = arith.constant 0 : i32
    %c0_i32_0 = arith.constant 0 : i32
    %c0_i32_1 = arith.constant 0 : i32
    return %c0_i32, %c0_i32_0 : i32, i32
  }
  func.func @transform_5(%arg0: i32, %arg1: i32) -> (i32, i32) {
    %c0_i32 = arith.constant 0 : i32
    %c0_i32_0 = arith.constant 0 : i32
    %c0_i32_1 = arith.constant 0 : i32
    return %c0_i32, %c0_i32_0 : i32, i32
  }
  func.func @transform_6(%arg0: i32, %arg1: i32) -> (i32, i32) {
    %c0_i32 = arith.constant 0 : i32
    %c0_i32_0 = arith.constant 0 : i32
    %c0_i32_1 = arith.constant 0 : i32
    return %c0_i32, %c0_i32_0 : i32, i32
  }
  func.func @transform_7(%arg0: i32, %arg1: i32) -> (i32, i32, i32, i32) {
    %c0_i32 = arith.constant 0 : i32
    %c0_i32_0 = arith.constant 0 : i32
    %c0_i32_1 = arith.constant 0 : i32
    return %arg0, %arg1, %c0_i32, %c0_i32_0 : i32, i32, i32, i32
  }
}

</mosaic_0001>

<bundles_post_ra>
// kernel: cls3d_forward.1
= control target key start
LH: loop header
LB: loop body
LE: loop exit
PB: predicated region body
PF: predicated region fallthrough
CT: control target
= control target key end

     0   :  { %s1167_s24 = smov 0   ;;  %s1169_s25 = smov 0   ;;  %s1396_s0 = inlined_call_operand.vmem [shape: f32[128,3], index: 0, kind: input, shape index: {}]   ;;  %s1397_s1 = inlined_call_operand.vmem [shape: f32[3,64], index: 1, kind: input, shape index: {}]   ;;  %s1398_s2 = inlined_call_operand.vmem [shape: f32[1,64], index: 2, kind: input, shape index: {}]   ;;  %s1399_s3 = inlined_call_operand.vmem [shape: bf16[64,128], index: 3, kind: input, shape index: {}]   ;;  %s1400_s4 = inlined_call_operand.vmem [shape: f32[1,128], index: 4, kind: input, shape index: {}]   ;;  %s1401_s5 = inlined_call_operand.vmem [shape: bf16[128,256], index: 5, kind: input, shape index: {}]   ;;  %s1402_s6 = inlined_call_operand.vmem [shape: f32[1,256], index: 6, kind: input, shape index: {}]   ;;  %s1403_s7 = inlined_call_operand.vmem [shape: f32[2,1,1,256], index: 7, kind: output, shape index: {}]  }
   0x1   :  { %s1171_s26 = smov 0  }
   0x2 LB: > { %s29_s27 = sadd.s32 1, %s1117_s25  ;;  %p957_p0 = scmp.ge.s32.totalorder %s1121_s26, 1  ;;  %s1121_s26 = sphi %s1171_s26, %s17_s26   ;;  %s1117_s25 = sphi %s1169_s25, %s1405_s25   ;;  %s1113_s24 = sphi %s1167_s24, %s1404_s24  }
   0x3   : > { %p31_p1 = scmp.ge.s32.totalorder %s29_s27, 2  ;;  %p256_p2 = scmp.lt.s32.totalorder %s1121_s26, 3 }
   0x5   : > { %s1407_s27 = smov (%p31_p1, %s29_s27), 0  ;;  %p257_p3 = pnand %p957_p0, %p256_p2 }
   0x6   : > { %s958_s28 = sshll.u32 (!%p257_p3), %s1113_s24, 3  ;;  %p300_p5 = scmp.lt.s32.totalorder (!%p257_p3), %s1113_s24, 1 }
   0x7   : > { %260 = sbr.rel (%p257_p3) target bundleno = 649 (0x289), region = 48  ;;  %p294_p4 = scmp.lt.s32.totalorder (!%p257_p3), %s958_s28, 15 }
   0xc   : > { %v1123_v0 = vmov 1   ;;  %v1124_v1 = vmov 0   ;;  %s1409_s28 = smov (!%p294_p4, %s958_s28), 15  ;;  %v1125_v4 = vmov 2   ;;  %v1071_v8 = vld [vmem:[%s1399_s3 + $0x18] sm:$0xff]   ;;  %v1072_v9 = vld [vmem:[%s1399_s3 + $0x10] sm:$0xff]   ;;  %v358_v26 = vlaneseq }
   0xd   : > { %1058 = vset.pattern.permute.xlu1 %v1123_v0  ;;  %1057 = vset.pattern.permute.xlu0 %v1124_v1  ;;  %s959_s29 = sshll.u32 %s1409_s28, 3  ;;  %v1073_v10 = vld [vmem:[%s1399_s3 + $0x8] sm:$0xff]   ;;  %v1074_v12 = vld [vmem:[%s1399_s3] sm:$0xff]   ;;  %v1075_v15 = vld [vmem:[%s1401_s5 + $0x74] ss:$8 sps:$4 sm:$0xff]   ;;  %vm540_vm0 = vcmask 523264  }
   0xe   : > { %780 = vmatprep.mubr.bf16.mxu1 %v1124_v1  ;;  %s1193_s9 = scalar_lea.vmem %s1396_s0, %s959_s29  ;;  %997 = vmatprep.subr.bf16.mxu0 %v1071_v8  ;;  %v1225_v16 = vld [vmem:[%s1401_s5 + $0x70] ss:$8 sps:$4 sm:$0xff]   ;;  %v1230_v17 = vld [vmem:[%s1401_s5 + $0x64] ss:$8 sps:$4 sm:$0xff]   ;;  %v1236_v18 = vld [vmem:[%s1401_s5 + $0x60] ss:$8 sps:$4 sm:$0xff]  }
   0xf   : > { %v309_v2 = vld [vmem:[%s1193_s9] sm:$0xff]  ;;  %v310_v3 = vld [vmem:[%s1193_s9 + $0x8] sm:$0xff]  ;;  %v312_v5 = vld [vmem:[%s1193_s9 + $0x18] sm:$0xff]  ;;  %998 = vmatpush3.bf16.msra.mxu0 %v1071_v8  ;;  %1013 = vmatprep.subr.bf16.mxu1 %v1075_v15  ;;  %v1283_v28 = vshrl.u32 %v358_v26, 7  ;;  %s1411_s24 = smov (!%p300_p5, %s1113_s24), 1  ;;  %vm873_vm1 = vcmp.lt.s32.totalorder %v358_v26, 256 }
  0x10   : > { %371 = vperm.xlu1 %1058, %v309_v2   ;;  %320 = vperm.xlu0 %1057, %v309_v2   ;;  %v311_v6 = vld [vmem:[%s1193_s9 + $0x10] sm:$0xff]  ;;  %v313_v7 = vld [vmem:[%s1193_s9 + $0x20] sm:$0xff]  ;;  %v314_v11 = vld [vmem:[%s1193_s9 + $0x28] sm:$0xff]  ;;  %s960_s20 = sshll.u32 %s1411_s24, 1 }
  0x11   : > { %999 = vmatprep.subr.bf16.mxu0 %v1072_v9  ;;  %v315_v13 = vld [vmem:[%s1193_s9 + $0x30] sm:$0xff]  ;;  %v316_v14 = vld [vmem:[%s1193_s9 + $0x38] sm:$0xff]  ;;  %1021 = vmatpush1.bf16.msra.mxu1 %v1225_v16  ;;  %v1254_v21 = vld [vmem:[%s1401_s5 + $0x44] ss:$8 sps:$4 sm:$0xff]   ;;  %v360_v31 = vsub.s32 0, %v1283_v28  ;;  %v404_v34 = vsub.s32 1, %v1283_v28  ;;  %s307_s23 = scalar_lea.vmem %s1403_s7, %s960_s20 }
  0x12   : > { %1014 = vmatprep.subr.bf16.mxu1 %v1230_v17  ;;  %v1242_v19 = vld [vmem:[%s1401_s5 + $0x54] ss:$8 sps:$4 sm:$0xff]   ;;  %v1248_v20 = vld [vmem:[%s1401_s5 + $0x50] ss:$8 sps:$4 sm:$0xff]   ;;  %v1260_v22 = vld [vmem:[%s1401_s5 + $0x40] ss:$8 sps:$4 sm:$0xff]  }
  0x13   : > { %1000 = vmatpush3.bf16.msra.mxu0 %v1072_v9  ;;  %v1266_v23 = vld [vmem:[%s1401_s5 + $0x34] ss:$8 sps:$4 sm:$0xff]   ;;  %v1272_v24 = vld [vmem:[%s1401_s5 + $0x30] ss:$8 sps:$4 sm:$0xff]   ;;  %v1278_v25 = vld [vmem:[%s1401_s5 + $0x24] ss:$8 sps:$4 sm:$0xff]  }
  0x14   : > { %375 = vperm.xlu1 %1058, %v310_v3   ;;  %1062 = vset.pattern.permute.xlu0 %v1125_v4  ;;  %v317_v33 = vld [vmem:[%s1397_s1] sm:$0x7]  ;;  %v456_v35 = vsub.s32 2, %v1283_v28 }
  0x15   : > { %427 = vperm.xlu0 %1062, %v310_v3   ;;  %1001 = vmatprep.subr.bf16.mxu0 %v1073_v10  ;;  %v1293_v36 = vrot.slane %v317_v33, %v360_v31  ;;  %v1297_v38 = vrot.slane %v317_v33, %v404_v34  ;;  %v1309_v52 = vld [vmem:[%s1398_s2] ss:$0 sm:$0xff] }
  0x16   : > { %1022 = vmatpush1.bf16.msra.mxu1 %v1236_v18  ;;  %v1299_v39 = vrot.slane %v317_v33, %v456_v35 }
  0x17   : > { %1002 = vmatpush3.bf16.msra.mxu0 %v1073_v10  ;;  %1015 = vmatprep.subr.bf16.mxu1 %v1242_v19 }
  0x18   : > { %1059 = vset.pattern.permute.xlu1 %v1124_v1  ;;  %1003 = vmatprep.subr.bf16.mxu0 %v1074_v12 }
  0x19   : > { %335 = vperm.xlu1 %1059, %v312_v5   ;;  %1063 = vset.pattern.permute.xlu0 %v1124_v1 }
  0x1a   : > { %325 = vperm.xlu0 %1063, %v310_v3   ;;  %1023 = vmatpush1.bf16.msra.mxu1 %v1248_v20 }
  0x1b   : > { %1004 = vmatpush3.bf16.msra.mxu0 %v1074_v12  ;;  %1016 = vmatprep.subr.bf16.mxu1 %v1254_v21 }
  0x1c   : > { %738 = vmatprep.subr.bf16.mxu0 %v1075_v15 }
  0x1d   : > { %1060 = vset.pattern.permute.xlu1 %v1123_v0 }
  0x1e   : > { %383 = vperm.xlu1 %1060, %v312_v5   ;;  %330 = vperm.xlu0 %1063, %v311_v6  }
  0x1f   : > { %1024 = vmatpush1.bf16.msra.mxu1 %v1260_v22 }
  0x20   : > { %1017 = vmatprep.subr.bf16.mxu1 %v1266_v23 }
  0x22   : > { %1061 = vset.pattern.permute.xlu1 %v1125_v4  ;;  %340 = vperm.xlu0 %1063, %v313_v7  }
  0x23   : > { %423 = vperm.xlu1 %1061, %v309_v2   ;;  %1025 = vmatpush1.bf16.msra.mxu1 %v1272_v24 }
  0x24   : > { %1018 = vmatprep.subr.bf16.mxu1 %v1278_v25 }
  0x26   : > { %1064 = vset.pattern.permute.xlu0 %v1123_v0 }
  0x27   : > { %431 = vperm.xlu1 %1061, %v311_v6   ;;  %379 = vperm.xlu0 %1064, %v311_v6  }
  0x2b   : > { %435 = vperm.xlu1 %1061, %v312_v5   ;;  %391 = vperm.xlu0 %1064, %v314_v11  }
  0x2f   : > { %1065 = vset.pattern.permute.xlu1 %v1124_v1  ;;  %395 = vperm.xlu0 %1064, %v315_v13  }
  0x30   : > { %345 = vperm.xlu1 %1065, %v314_v11  }
  0x33   : > { %1069 = vset.pattern.permute.xlu0 %v1125_v4 }
  0x34   : > { %1066 = vset.pattern.permute.xlu1 %v1123_v0  ;;  %439 = vperm.xlu0 %1069, %v313_v7  }
  0x35   : > { %387 = vperm.xlu1 %1066, %v313_v7  }
  0x38   : > { %451 = vperm.xlu0 %1069, %v316_v14  }
  0x39   : > { %1067 = vset.pattern.permute.xlu1 %v1124_v1 }
  0x3a   : > { %350 = vperm.xlu1 %1067, %v315_v13  }
  0x3e   : > { %355 = vperm.xlu1 %1067, %v316_v14  }
  0x42   : > { %1068 = vset.pattern.permute.xlu1 %v1123_v0 }
  0x43   : > { %399 = vperm.xlu1 %1068, %v316_v14  }
  0x47   : > { %1070 = vset.pattern.permute.xlu1 %v1125_v4 }
  0x48   : > { %443 = vperm.xlu1 %1070, %v314_v11  }
  0x4c   : > { %447 = vperm.xlu1 %1070, %v315_v13  }
  0x8b   : > { %v372_v27 = vpop.permute.xlu1 %371  ;;  %v321_v29 = vpop.permute.xlu0 %320 }
  0x8c   : > { %v406_v47 = vmul.f32 %v1297_v38, %v372_v27  ;;  %v362_v48 = vmul.f32 %v1293_v36, %v321_v29 }
  0x8e   : > { %v414_v53 = vadd.f32 %v406_v47, %v362_v48 }
  0x8f   : > { %v376_v30 = vpop.permute.xlu1 %375 }
  0x90   : > { %v428_v32 = vpop.permute.xlu0 %427  ;;  %v407_v42 = vmul.f32 %v1297_v38, %v376_v30 }
  0x91   : > { %v459_v43 = vmul.f32 %v1299_v39, %v428_v32 }
  0x94   : > { %v336_v37 = vpop.permute.xlu1 %335 }
  0x95   : > { %v326_v40 = vpop.permute.xlu0 %325  ;;  %v365_v63 = vmul.f32 %v1293_v36, %v336_v37 }
  0x96   : > { %v363_v41 = vmul.f32 %v1293_v36, %v326_v40 }
  0x98   : > { %v415_v44 = vadd.f32 %v407_v42, %v363_v41 }
  0x99   : > { %v384_v45 = vpop.permute.xlu1 %383  ;;  %v331_v46 = vpop.permute.xlu0 %330 }
  0x9a   : > { %v467_v49 = vadd.f32 %v459_v43, %v415_v44  ;;  %v364_v55 = vmul.f32 %v1293_v36, %v331_v46  ;;  %v409_v60 = vmul.f32 %v1297_v38, %v384_v45 }
  0x9c   : > { %v482_v57 = vadd.f32 %v1309_v52, %v467_v49  ;;  %v417_v6 = vadd.f32 %v409_v60, %v365_v63  ;;  %v1093_v63 = vld [vmem:[%s1401_s5 + $0x14] ss:$8 sps:$4 sm:$0xff]  }
  0x9d   : > { %v341_v50 = vpop.permute.xlu0 %340 }
  0x9e   : > { %v424_v51 = vpop.permute.xlu1 %423  ;;  %v490_v4 = vmax.f32 %v482_v57, 0.0  ;;  %v366_v41 = vmul.f32 %v1293_v36, %v341_v50 }
  0x9f   : > { %v458_v54 = vmul.f32 %v1299_v39, %v424_v51 }
  0xa1   : > { %v466_v56 = vadd.f32 %v458_v54, %v414_v53 }
  0xa2   : > { %v432_v58 = vpop.permute.xlu1 %431  ;;  %v380_v59 = vpop.permute.xlu0 %379 }
  0xa3   : > { %v408_v61 = vmul.f32 %v1297_v38, %v380_v59  ;;  %v481_v62 = vadd.f32 %v1309_v52, %v466_v56  ;;  %v460_v0 = vmul.f32 %v1299_v39, %v432_v58 }
  0xa5   : > { %v416_v2 = vadd.f32 %v408_v61, %v364_v55  ;;  %v489_v3 = vmax.f32 %v481_v62, 0.0 }
  0xa6   : > { %v436_v5 = vpop.permute.xlu1 %435  ;;  %v392_v29 = vpop.permute.xlu0 %391 }
  0xa7   : > { %v468_v7 = vadd.f32 %v460_v0, %v416_v2  ;;  %v461_v8 = vmul.f32 %v1299_v39, %v436_v5  ;;  %v497_v9 = vpack.c.bf16 %v490_v4, %v489_v3  ;;  %v1096_v0 = vld [vmem:[%s1401_s5 + $0x4] ss:$8 sps:$4 sm:$0xff]   ;;  %v1098_v2 = vld [vmem:[%s1401_s5] ss:$8 sps:$4 sm:$0xff]  }
  0xa8   : > { %v962_v4 = vld [vmem:[%s1400_s4] ss:$0 sm:$0xff] }
  0xa9   : > { %v483_v10 = vadd.f32 %v1309_v52, %v468_v7  ;;  %v469_v11 = vadd.f32 %v461_v8, %v417_v6  ;;  %1005 = vmatprep.mubr.msk.bf16.mxu0 %vm540_vm0, %v497_v9 }
  0xaa   : > { %v396_v32 = vpop.permute.xlu0 %395 }
  0xab   : > { %v484_v12 = vadd.f32 %v1309_v52, %v469_v11  ;;  %v346_v13 = vpop.permute.xlu1 %345  ;;  %v491_v14 = vmax.f32 %v483_v10, 0.0  ;;  %v412_v48 = vmul.f32 %v1297_v38, %v396_v32 }
  0xad   : > { %v492_v15 = vmax.f32 %v484_v12, 0.0 }
  0xaf   : > { %v498_v27 = vpack.c.bf16 %v492_v15, %v491_v14  ;;  %v440_v40 = vpop.permute.xlu0 %439 }
  0xb0   : > { %v388_v30 = vpop.permute.xlu1 %387 }
  0xb1   : > { %1006 = vmatmul.mubr.msk.bf16.vlgmr.msra.gmra.mxu0 %vm540_vm0, %v498_v27  ;;  %v410_v37 = vmul.f32 %v1297_v38, %v388_v30 }
  0xb2   : > { %739 = vmatpush1.bf16.msra.mxu0 %v1225_v16  ;;  %v462_v16 = vmul.f32 %v1299_v39, %v440_v40 }
  0xb3   : > { %740 = vmatprep.subr.bf16.mxu0 %v1230_v17  ;;  %v418_v42 = vadd.f32 %v410_v37, %v366_v41  ;;  %v452_v43 = vpop.permute.xlu0 %451 }
  0xb4   : > { %v465_v46 = vmul.f32 %v1299_v39, %v452_v43 }
  0xb5   : > { %v351_v33 = vpop.permute.xlu1 %350 }
  0xb6   : > { %741 = vmatpush1.bf16.msra.mxu0 %v1236_v18 }
  0xb7   : > { %742 = vmatprep.subr.bf16.mxu0 %v1242_v19  ;;  %v411_v19 = vmul.f32 %v1297_v38, %v392_v29 }
  0xb9   : > { %v356_v35 = vpop.permute.xlu1 %355 }
  0xba   : > { %743 = vmatpush1.bf16.msra.mxu0 %v1248_v20  ;;  %v367_v20 = vmul.f32 %v1293_v36, %v346_v13  ;;  %v369_v44 = vmul.f32 %v1293_v36, %v356_v35 }
  0xbb   : > { %744 = vmatprep.subr.bf16.mxu0 %v1254_v21  ;;  %v470_v21 = vadd.f32 %v462_v16, %v418_v42 }
  0xbd   : > { %v485_v50 = vadd.f32 %v1309_v52, %v470_v21 }
  0xbe   : > { %v400_v17 = vpop.permute.xlu1 %399  ;;  %745 = vmatpush1.bf16.msra.mxu0 %v1260_v22  ;;  %v419_v22 = vadd.f32 %v411_v19, %v367_v20 }
  0xbf   : > { %v413_v18 = vmul.f32 %v1297_v38, %v400_v17  ;;  %746 = vmatprep.subr.bf16.mxu0 %v1266_v23  ;;  %v368_v23 = vmul.f32 %v1293_v36, %v351_v33  ;;  %v493_v57 = vmax.f32 %v485_v50, 0.0 }
  0xc1   : > { %v421_v45 = vadd.f32 %v413_v18, %v369_v44  ;;  %v420_v55 = vadd.f32 %v412_v48, %v368_v23  ;;  %v646_v48 = vld [vmem:[%s1402_s6] sm:$0x3] }
  0xc2   : > { %747 = vmatpush1.bf16.msra.mxu0 %v1272_v24  ;;  %v651_v50 = vrot.slane %v646_v48, %v360_v31 }
  0xc3   : > { %v444_v47 = vpop.permute.xlu1 %443  ;;  %748 = vmatprep.subr.bf16.mxu0 %v1278_v25  ;;  %v473_v51 = vadd.f32 %v465_v46, %v421_v45 }
  0xc4   : > { %v463_v49 = vmul.f32 %v1299_v39, %v444_v47 }
  0xc5   : > { %v488_v25 = vadd.f32 %v1309_v52, %v473_v51 }
  0xc6   : > { %v471_v53 = vadd.f32 %v463_v49, %v419_v22 }
  0xc7   : > { %v448_v54 = vpop.permute.xlu1 %447  ;;  %v496_v60 = vmax.f32 %v488_v25, 0.0 }
  0xc8   : > { %v486_v56 = vadd.f32 %v1309_v52, %v471_v53  ;;  %v464_v24 = vmul.f32 %v1299_v39, %v448_v54  ;;  %v1092_v39 = vld [vmem:[%s1401_s5 + $0x20] ss:$8 sps:$4 sm:$0xff]   ;;  %v655_v54 = vrot.slane %v646_v48, %v404_v34 }
  0xc9   : > { %1026 = vmatpush1.bf16.msra.mxu1 %v1092_v39  ;;  %749 = vmatpush1.bf16.msra.mxu0 %v1092_v39 }
  0xca   : > { %v494_v58 = vmax.f32 %v486_v56, 0.0  ;;  %v472_v59 = vadd.f32 %v464_v24, %v420_v55  ;;  %1019 = vmatprep.subr.bf16.mxu1 %v1093_v63  ;;  %750 = vmatprep.subr.bf16.mxu0 %v1093_v63 }
  0xcc   : > { %v499_v38 = vpack.c.bf16 %v494_v58, %v493_v57  ;;  %v487_v36 = vadd.f32 %v1309_v52, %v472_v59  ;;  %v1095_v52 = vld [vmem:[%s1401_s5 + $0x10] ss:$8 sps:$4 sm:$0xff]  }
  0xcd   : > { %1027 = vmatpush1.bf16.msra.mxu1 %v1095_v52  ;;  %751 = vmatpush1.bf16.msra.mxu0 %v1095_v52 }
  0xce   : > { %v495_v61 = vmax.f32 %v487_v36, 0.0  ;;  %1009 = vmatprep.mubr.msk.bf16.mxu0 %vm540_vm0, %v499_v38  ;;  %1020 = vmatprep.subr.bf16.mxu1 %v1096_v0 }
  0xcf   : > { %752 = vmatprep.subr.bf16.mxu0 %v1096_v0 }
  0xd0   : > { %v500_v62 = vpack.c.bf16 %v496_v60, %v495_v61 }
  0xd1   : > { %1028 = vmatpush1.bf16.msra.mxu1 %v1098_v2  ;;  %753 = vmatpush1.bf16.msra.mxu0 %v1098_v2 }
  0xd2   : > { %1010 = vmatmul.mubr.msk.bf16.gmra.mxu0 %vm540_vm0, %v500_v62 }
  0xd3   : > { %770 = vmatprep.mubr.bf16.mxu0 %v1124_v1 }
 0x171   : > { %v1007_v3 = vpop.f32.mrf.mxu0 }
 0x172   : > { %v596_v6 = vadd.f32 %v1007_v3, %v962_v4 }
 0x173   : > { %v587_v5 = vpop.f32.mrf.mxu0 }
 0x174   : > { %v588_v8 = vadd.f32 %v962_v4, %v587_v5  ;;  %v620_v11 = vmax.f32 %v596_v6, 0.0 }
 0x175   : > { %v1008_v7 = vpop.f32.mrf.mxu0 }
 0x176   : > { %v599_v9 = vadd.f32 %v1008_v7, %v962_v4  ;;  %v618_v14 = vmax.f32 %v588_v8, 0.0 }
 0x177   : > { %v590_v10 = vpop.f32.mrf.mxu0 }
 0x178   : > { %v621_v12 = vmax.f32 %v599_v9, 0.0  ;;  %v591_v13 = vadd.f32 %v962_v4, %v590_v10 }
 0x17a   : > { %v627_v15 = vpack.c.bf16 %v621_v12, %v620_v11  ;;  %v619_v27 = vmax.f32 %v591_v13, 0.0 }
 0x17c   : > { %v626_v29 = vpack.c.bf16 %v619_v27, %v618_v14  ;;  %781 = vmatmul.mubr.bf16.vlgmr.msra.gmra.mxu1 %v627_v15 }
 0x17d   : > { %790 = vmatprep.mubr.bf16.mxu1 %v1124_v1 }
 0x17e   : > { %771 = vmatmul.mubr.bf16.vlgmr.msra.gmra.mxu0 %v626_v29 }
 0x192   : > { %v1011_v30 = vpop.f32.mrf.mxu0 }
 0x193   : > { %v612_v18 = vadd.f32 %v1011_v30, %v962_v4 }
 0x194   : > { %v603_v32 = vpop.f32.mrf.mxu0 }
 0x195   : > { %v604_v35 = vadd.f32 %v962_v4, %v603_v32  ;;  %v624_v19 = vmax.f32 %v612_v18, 0.0 }
 0x196   : > { %v1012_v33 = vpop.f32.mrf.mxu0 }
 0x197   : > { %v622_v41 = vmax.f32 %v604_v35, 0.0  ;;  %v615_v16 = vadd.f32 %v1012_v33, %v962_v4 }
 0x198   : > { %v606_v37 = vpop.f32.mrf.mxu0 }
 0x199   : > { %v607_v40 = vadd.f32 %v962_v4, %v606_v37  ;;  %v625_v43 = vmax.f32 %v615_v16, 0.0 }
 0x19b   : > { %v623_v42 = vmax.f32 %v607_v40, 0.0  ;;  %v629_v20 = vpack.c.bf16 %v625_v43, %v624_v19 }
 0x19d   : > { %v628_v17 = vpack.c.bf16 %v623_v42, %v622_v41 }
 0x19f   : > { %791 = vmatmul.mubr.bf16.gmra.mxu1 %v628_v17 }
 0x1a0   : > { %800 = vmatprep.mubr.bf16.mxu1 %v1124_v1 }
 0x1a7   : > { %801 = vmatmul.mubr.bf16.gmra.mxu1 %v629_v20 }
 0x23c   : > { %v782_v44 = vpop.f32.mrf.mxu1 }
 0x23d   : > { %v783_v24 = vadd.f32 %v782_v44, %v651_v50 }
 0x23e   : > { %v784_v21 = vpop.f32.mrf.mxu1  ;;  %v772_v45 = vpop.f32.mrf.mxu0 }
 0x23f   : > { %v773_v53 = vadd.f32 %v772_v45, %v651_v50  ;;  %v785_v61 = vadd.f32 %v784_v21, %v655_v54  ;;  %v815_v2 = vmax.f32 %v783_v24, 0.0 }
 0x240   : > { %v786_v46 = vpop.f32.mrf.mxu1  ;;  %v774_v47 = vpop.f32.mrf.mxu0 }
 0x241   : > { %v775_v57 = vadd.f32 %v774_v47, %v655_v54  ;;  %v787_v38 = vadd.f32 %v786_v46, %v651_v50  ;;  %v811_v60 = vmax.f32 %v773_v53, 0.0  ;;  %v816_v10 = vmax.f32 %v785_v61, 0.0 }
 0x242   : > { %v788_v22 = vpop.f32.mrf.mxu1  ;;  %v776_v23 = vpop.f32.mrf.mxu0 }
 0x243   : > { %v777_v56 = vadd.f32 %v776_v23, %v651_v50  ;;  %v789_v62 = vadd.f32 %v788_v22, %v655_v54  ;;  %v812_v3 = vmax.f32 %v775_v57, 0.0  ;;  %v817_v6 = vmax.f32 %v787_v38, 0.0 }
 0x244   : > { %v778_v51 = vpop.f32.mrf.mxu0  ;;  %v827_v9 = vmax.f32 %v811_v60, %v815_v2 }
 0x245   : > { %v779_v25 = vadd.f32 %v778_v51, %v655_v54  ;;  %v813_v63 = vmax.f32 %v777_v56, 0.0  ;;  %v818_v11 = vmax.f32 %v789_v62, 0.0  ;;  %v840_v30 = vmax.f32 %v812_v3, %v816_v10 }
 0x247   : > { %v814_v34 = vmax.f32 %v779_v25, 0.0  ;;  %v828_v14 = vmax.f32 %v813_v63, %v817_v6 }
 0x249   : > { %v841_v32 = vmax.f32 %v814_v34, %v818_v11 }
 0x25f   : > { %v792_v49 = vpop.f32.mrf.mxu1 }
 0x260   : > { %v793_v58 = vadd.f32 %v792_v49, %v651_v50  ;;  %v1126_v49 = vmov 1966171168  }
 0x261   : > { %v794_v1 = vpop.f32.mrf.mxu1 }
 0x262   : > { %v795_v39 = vadd.f32 %v794_v1, %v655_v54  ;;  %v819_v4 = vmax.f32 %v793_v58, 0.0 }
 0x263   : > { %v796_v55 = vpop.f32.mrf.mxu1 }
 0x264   : > { %v797_v36 = vadd.f32 %v796_v55, %v651_v50  ;;  %v820_v12 = vmax.f32 %v795_v39, 0.0  ;;  %v829_v33 = vmax.f32 %v827_v9, %v819_v4 }
 0x265   : > { %v798_v59 = vpop.f32.mrf.mxu1 }
 0x266   : > { %v799_v52 = vadd.f32 %v798_v59, %v655_v54  ;;  %v821_v7 = vmax.f32 %v797_v36, 0.0  ;;  %v842_v16 = vmax.f32 %v840_v30, %v820_v12 }
 0x267   : > { %v802_v31 = vpop.f32.mrf.mxu1 }
 0x268   : > { %v803_v0 = vadd.f32 %v802_v31, %v651_v50  ;;  %v822_v15 = vmax.f32 %v799_v52, 0.0  ;;  %v830_v37 = vmax.f32 %v828_v14, %v821_v7 }
 0x269   : > { %v804_v5 = vpop.f32.mrf.mxu1 }
 0x26a   : > { %v805_v8 = vadd.f32 %v804_v5, %v655_v54  ;;  %v823_v27 = vmax.f32 %v803_v0, 0.0  ;;  %v843_v17 = vmax.f32 %v841_v32, %v822_v15 }
 0x26b   : > { %v806_v13 = vpop.f32.mrf.mxu1 }
 0x26c   : > { %v807_v29 = vadd.f32 %v806_v13, %v651_v50  ;;  %v824_v40 = vmax.f32 %v805_v8, 0.0  ;;  %v831_v18 = vmax.f32 %v829_v33, %v823_v27  ;;  %v857_v50 = vunpack.c.l.s4 %v1126_v49 }
 0x26d   : > { %v808_v35 = vpop.f32.mrf.mxu1 }
 0x26e   : > { %v825_v41 = vmax.f32 %v807_v29, 0.0  ;;  %v809_v42 = vadd.f32 %v808_v35, %v655_v54  ;;  %v844_v20 = vmax.f32 %v842_v16, %v824_v40  ;;  %v858_v55 = vunpack.c.0.s8 %v857_v50 }
 0x270   : > { %v832_v43 = vmax.f32 %v830_v37, %v825_v41  ;;  %v826_v19 = vmax.f32 %v809_v42, 0.0  ;;  %v861_v25 = vsub.s32 %v858_v55, %v1283_v28 }
 0x272   : > { %v833_v44 = vmax.f32 %v831_v18, %v832_v43  ;;  %v845_v21 = vmax.f32 %v843_v17, %v826_v19 }
 0x274   : > { %v834_v45 = vrot.slane %v833_v44, 4  ;;  %v846_v46 = vmax.f32 %v844_v20, %v845_v21 }
 0x276   : > { %v835_v47 = vmax.f32 %v833_v44, %v834_v45  ;;  %v847_v22 = vrot.slane %v846_v46, 4 }
 0x278   : > { %v836_v48 = vrot.slane %v835_v47, 2  ;;  %v848_v23 = vmax.f32 %v846_v46, %v847_v22 }
 0x27a   : > { %v837_v1 = vmax.f32 %v835_v47, %v836_v48  ;;  %v849_v51 = vrot.slane %v848_v23, 2 }
 0x27c   : > { %v838_v53 = vrot.slane %v837_v1, 1  ;;  %v850_v54 = vmax.f32 %v848_v23, %v849_v51 }
 0x27e   : > { %v851_v56 = vrot.slane %v850_v54, 1  ;;  %v839_v24 = vmax.f32 %v837_v1, %v838_v53 }
 0x280   : > { %v852_v57 = vmax.f32 %v850_v54, %v851_v56 }
 0x282   : > { %v855_v58 = vcombine.low %v839_v24, %v852_v57 }
 0x284   : > { %v862_v59 = vrot.slane %v855_v58, %v861_v25 }
 0x286   : > { %v869_v38 = vrot.slane %v862_v59, %v861_v25 }
 0x288   : > { %875 = vst.msk [vmem:[%s307_s23] sm:$0x3] %vm873_vm1, %v869_v38 }
 0x289 PF: > { %s17_s26 = sadd.s32 1, %s1121_s26   ;;  %s1404_s24 = smov %s1117_s25 }
 0x28a   : > { %p14_p6 = scmp.ge.s32.totalorder %s17_s26, 4   ;;  %s1405_s25 = smov %s1407_s27 }
 0x28c   :  { %16 = sbr.rel (!%p14_p6) target bundleno = 2 (0x2), region = 78 }

</bundles_post_ra>
